<compile_context>
chip_gen: v6e
topology: v6e:2x2x1
jax: 0.10.0
libtpu: 0.0.40
codegen_flags: <defaults>
</compile_context>

<pallas_src>
import jax
import jax.numpy as jnp
from jax.experimental import pallas as pl
from jax.experimental.pallas import tpu as pltpu

_LANES = 128
_ACC_ROWS = 32     # per-core accumulator height (4 f32 vregs -> 4 VALU chains)
_ROW_ALIGN = 32    # multiple of sublane packing for f32(8)/bf16(16)/int8(32)
                   # and of _ACC_ROWS


def _round_up(x, m):
    return ((x + m - 1) // m) * m


def _device_kind():
    try:
        return jax.devices()[0].device_kind.lower()
    except Exception:
        return ""


def _make_bce_kernel(tile_rows, tiles_per_core, n_tiles, n_valid, binary_target):
    """Per-tile partial-sum kernel; static params baked in."""
    chunk = tile_rows * _LANES
    last_tile = n_tiles - 1

    def kernel(p_ref, t_ref, o_ref):
        i = pl.program_id(0)   # parallel (core) axis
        k = pl.program_id(1)   # reduction axis

        # Zero this core's resident (32, 128) partial accumulator once per sweep.
        @pl.when(k == 0)
        def _():
            o_ref[...] = jnp.zeros_like(o_ref)

        logical_tile = i * tiles_per_core + k

        # Skip ALL compute (vector loads, clip, logs) for clamped duplicate
        # tiles that only exist to keep the grid rectangular.
        @pl.when(logical_tile <= last_tile)
        def _():
            p = jnp.clip(p_ref[...].astype(jnp.float32), 0.0, 0.999)
            t_raw = t_ref[...]

            if binary_target:
                # Single EUP log per element (valid only for 0/1 targets).
                q = jnp.where(t_raw != 0, p, 1.0 - p)
                val = jnp.maximum(jnp.log(q), -100.0)
            else:
                # Soft-label path (exact PyTorch semantics).
                t = t_raw.astype(jnp.float32)
                log_p = jnp.maximum(jnp.log(p), -100.0)
                log_1mp = jnp.log(1.0 - p)        # >= log(1e-3), clamp is dead
                val = log_1mp + t * (log_p - log_1mp)
            # `val` is +[t*log(p) + (1-t)*log(1-p)]; negated in the epilogue.

            # Interior tiles: fully valid -> pure VPU partial sums into o_ref.
            @pl.when(logical_tile < last_tile)
            def _():
                o_ref[...] += val.reshape(-1, _ACC_ROWS, _LANES).sum(axis=0)

            # The single edge tile: mask elements past the true element count
            # (covers both the 128-lane pad and the ragged last row block).
            @pl.when(logical_tile == last_tile)
            def _():
                base = logical_tile * chunk   # int32: n_valid < 2**31 asserted
                ridx = jax.lax.broadcasted_iota(jnp.int32, (tile_rows, _LANES), 0)
                cidx = jax.lax.broadcasted_iota(jnp.int32, (tile_rows, _LANES), 1)
                flat = base + ridx * _LANES + cidx
                masked = jnp.where(flat < n_valid, val, 0.0)
                o_ref[...] += masked.reshape(-1, _ACC_ROWS, _LANES).sum(axis=0)

    return kernel


def insight_val_loss(pred, target, *, binary_target=False, tile_rows=None,
                     num_parallel=None):
    """Mean BCE of clamp(pred, 0, 0.999) vs target (matches InsightValLoss).

    binary_target=True enables a single-log fast path that is only valid when
    every target element is exactly 0 or 1 (soft labels must use the default).
    """
    assert pred.shape == target.shape
    n_valid = pred.size
    assert 0 < n_valid < 2**31, "edge-mask index math is int32"

    # Never widen before the DMA: narrow bool/int targets to int8; keep
    # floating targets (f32 / bf16 soft labels) and pred in their native dtype.
    if target.dtype == jnp.bool_ or jnp.issubdtype(target.dtype, jnp.integer):
        target = target.astype(jnp.int8)

    p_flat = pred.reshape(-1)
    t_flat = target.reshape(-1)

    # Lane-dense (rows, 128) view.  Pad only to the 128-lane boundary (usually
    # a no-op); tiny inputs are padded up to one full 32-row tile so the single
    # block exactly covers the array.
    rows = pl.cdiv(n_valid, _LANES)
    rows = max(rows, _ROW_ALIGN)
    padded = rows * _LANES
    pad = padded - n_valid
    if pad:
        p_flat = jnp.pad(p_flat, (0, pad))
        t_flat = jnp.pad(t_flat, (0, pad))

    p2d = p_flat.reshape(rows, _LANES)
    t2d = t_flat.reshape(rows, _LANES)

    kind = _device_kind()
    if tile_rows is None:
        # Combined-input block byte budget, double-buffered by the pipeline:
        #   v6e/v7x: 8 MiB -> 16 MiB, under the 32 MiB default scoped VMEM.
        #   v5e / unknown: 4 MiB -> 8 MiB, under the 16 MiB default.
        is_v6_plus = any(s in kind for s in ("v6", "v7", "7x"))
        budget = (8 << 20) if is_v6_plus else (4 << 20)
        bytes_per_row = _LANES * (p2d.dtype.itemsize + t2d.dtype.itemsize)
        tile_rows = max(_ROW_ALIGN, budget // bytes_per_row)
    if num_parallel is None:
        # Two TensorCores only on v7x; the split is pure overhead on v5e/v6e.
        num_parallel = 2 if ("v7" in kind or "7x" in kind) else 1

    tr = min(tile_rows, rows)
    tr = _round_up(max(tr, 1), _ROW_ALIGN)
    n_tiles = pl.cdiv(rows, tr)

    n_cores = num_parallel if (num_parallel > 1 and n_tiles >= num_parallel) else 1
    tiles_per_core = pl.cdiv(n_tiles, n_cores)
    last_tile = n_tiles - 1

    def in_map(i, k):
        # Clamp so the trailing core never DMAs past the array; clamped
        # (duplicate) tiles skip all compute in-kernel.
        return (jnp.minimum(i * tiles_per_core + k, last_tile), 0)

    kernel = _make_bce_kernel(tr, tiles_per_core, n_tiles, n_valid, binary_target)

    partials = pl.pallas_call(
        kernel,
        out_shape=jax.ShapeDtypeStruct((n_cores * _ACC_ROWS, _LANES), jnp.float32),
        grid_spec=pltpu.PrefetchScalarGridSpec(
            num_scalar_prefetch=0,
            grid=(n_cores, tiles_per_core),
            in_specs=[
                pl.BlockSpec((tr, _LANES), in_map),
                pl.BlockSpec((tr, _LANES), in_map),
            ],
            out_specs=pl.BlockSpec((_ACC_ROWS, _LANES), lambda i, k: (i, 0)),
        ),
        compiler_params=pltpu.CompilerParams(
            dimension_semantics=("parallel", "arbitrary"),
        ),
    )(p2d, t2d)

    # Cross-lane reduction, negation and mean normalization are cheap XLA glue.
    return -jnp.sum(partials) / jnp.float32(n_valid)


def _reference_loss(pred, target):
    p = jnp.clip(pred.astype(jnp.float32), 0.0, 0.999)
    t = target.astype(jnp.float32)
    log_p = jnp.maximum(jnp.log(p), -100.0)
    log_1mp = jnp.maximum(jnp.log(1.0 - p), -100.0)
    return jnp.mean(-(t * log_p + (1.0 - t) * log_1mp))


if __name__ == "__main__":
    key = jax.random.PRNGKey(0)
    kp, kt, kp2, kt2 = jax.random.split(key, 4)

    # Test 1: NCHW f32 pred + f32 target, default (soft-label) path,
    # exercising the clamp on both ends (values in [-0.1, 1.2)).
    B, C, H, W = 2, 4, 16, 16
    pred = jax.random.uniform(kp, (B, C, H, W), jnp.float32, -0.1, 1.2)
    target = (jax.random.uniform(kt, (B, C, H, W)) > 0.5).astype(jnp.float32)
    loss = jax.block_until_ready(insight_val_loss(pred, target))
    ref = _reference_loss(pred, target)
    assert jnp.allclose(loss, ref, rtol=1e-4, atol=1e-5), (loss, ref)

    # Test 2: ragged shape, bf16 pred + bool target (narrowed to int8 in the
    # wrapper), small tiles forcing multi-tile accumulation, a forced 2-way
    # core split with a clamped duplicate tile, the in-kernel tail mask, and
    # the single-log binary fast path.
    shape2 = (2, 5, 33, 29)   # 9570 elems -> 75 rows -> 3 tiles of 32 rows
    pred2 = jax.random.uniform(kp2, shape2, jnp.float32, -0.1, 1.2).astype(jnp.bfloat16)
    target2 = jax.random.uniform(kt2, shape2) > 0.5
    loss2 = jax.block_until_ready(
        insight_val_loss(pred2, target2, binary_target=True,
                         tile_rows=32, num_parallel=2))
    ref2 = _reference_loss(pred2, target2)
    assert jnp.allclose(loss2, ref2, rtol=1e-4, atol=1e-5), (loss2, ref2)

    # Test 3: same inputs through the default (soft-label) path for coverage.
    loss3 = jax.block_until_ready(
        insight_val_loss(pred2, target2, tile_rows=32, num_parallel=2))
    assert jnp.allclose(loss3, ref2, rtol=1e-4, atol=1e-5), (loss3, ref2)

    print("KERNEL_OK")
</pallas_src>

<mosaic_0001>
module attributes {stable_mosaic.version = 11 : i64} {
  func.func @kernel(%arg0: i32, %arg1: i32, %arg2: memref<32x128xf32, #tpu.memory_space<vmem>>, %arg3: memref<32x128xf32, #tpu.memory_space<vmem>>, %arg4: memref<32x128xf32, #tpu.memory_space<vmem>>) attributes {dimension_semantics = [#tpu.dimension_semantics<parallel>, #tpu.dimension_semantics<arbitrary>], iteration_bounds = array<i64: 1, 1>, scalar_prefetch = 0 : i64, scratch_operands = 0 : i64, tpu.core_type = #tpu.core_type<tc>, window_params = [{transform_indices = @transform_0, window_bounds = array<i64: 32, 128>}, {transform_indices = @transform_1, window_bounds = array<i64: 32, 128>}, {transform_indices = @transform_2, window_bounds = array<i64: 32, 128>}]} {
    %c0_i32 = arith.constant 0 : i32
    %0 = arith.cmpi eq, %arg1, %c0_i32 : i32
    %1 = arith.extui %0 : i1 to i32
    %c0_i32_0 = arith.constant 0 : i32
    %2 = arith.cmpi ne, %1, %c0_i32_0 : i32
    scf.if %2 {
      %cst = arith.constant 0.000000e+00 : f32
      %8 = vector.broadcast %cst : f32 to vector<32x128xf32>
      %c0 = arith.constant 0 : index
      %c0_3 = arith.constant 0 : index
      %9 = vector.load %arg4[%c0, %c0_3] : memref<32x128xf32, #tpu.memory_space<vmem>>, vector<32x128xf32>
      tpu.vector_store %arg4[%c0, %c0_3], %8 {strides = array<i32>} : memref<32x128xf32, #tpu.memory_space<vmem>>, vector<32x128xf32>,
    } else {
    }
    %c1_i32 = arith.constant 1 : i32
    %3 = arith.muli %arg0, %c1_i32 : i32
    %4 = arith.addi %3, %arg1 : i32
    %c0_i32_1 = arith.constant 0 : i32
    %5 = arith.cmpi sle, %4, %c0_i32_1 : i32
    %6 = arith.extui %5 : i1 to i32
    %c0_i32_2 = arith.constant 0 : i32
    %7 = arith.cmpi ne, %6, %c0_i32_2 : i32
    scf.if %7 {
      %c0 = arith.constant 0 : index
      %c0_3 = arith.constant 0 : index
      %8 = vector.load %arg2[%c0, %c0_3] : memref<32x128xf32, #tpu.memory_space<vmem>>, vector<32x128xf32>
      %cst = arith.constant 0.000000e+00 : f32
      %cst_4 = arith.constant 9.990000e-01 : f32
      %9 = vector.broadcast %cst : f32 to vector<32x128xf32>
      %10 = arith.maximumf %9, %8 : vector<32x128xf32>
      %11 = vector.broadcast %cst_4 : f32 to vector<32x128xf32>
      %12 = arith.minimumf %11, %10 : vector<32x128xf32>
      %c0_5 = arith.constant 0 : index
      %c0_6 = arith.constant 0 : index
      %13 = vector.load %arg3[%c0_5, %c0_6] : memref<32x128xf32, #tpu.memory_space<vmem>>, vector<32x128xf32>
      %14 = math.log %12 : vector<32x128xf32>
      %cst_7 = arith.constant -1.000000e+02 : f32
      %15 = vector.broadcast %cst_7 : f32 to vector<32x128xf32>
      %16 = arith.maximumf %14, %15 : vector<32x128xf32>
      %cst_8 = arith.constant 1.000000e+00 : f32
      %17 = vector.broadcast %cst_8 : f32 to vector<32x128xf32>
      %18 = arith.subf %17, %12 : vector<32x128xf32>
      %19 = math.log %18 : vector<32x128xf32>
      %20 = arith.subf %16, %19 : vector<32x128xf32>
      %21 = arith.mulf %13, %20 : vector<32x128xf32>
      %22 = arith.addf %19, %21 : vector<32x128xf32>
      %c0_i32_9 = arith.constant 0 : i32
      %23 = arith.cmpi slt, %4, %c0_i32_9 : i32
      %24 = arith.extui %23 : i1 to i32
      %c0_i32_10 = arith.constant 0 : i32
      %25 = arith.cmpi ne, %24, %c0_i32_10 : i32
      scf.if %25 {
        %c0_13 = arith.constant 0 : index
        %c0_14 = arith.constant 0 : index
        %29 = vector.load %arg4[%c0_13, %c0_14] : memref<32x128xf32, #tpu.memory_space<vmem>>, vector<32x128xf32>
        %30 = vector.shape_cast %22 : vector<32x128xf32> to vector<1x32x128xf32>
        %cst_15 = arith.constant dense<0.000000e+00> : vector<32x128xf32>
        %31 = vector.multi_reduction <add>, %30, %cst_15 [0] : vector<1x32x128xf32> to vector<32x128xf32>
        %32 = arith.addf %29, %31 : vector<32x128xf32>
        %c0_16 = arith.constant 0 : index
        %c0_17 = arith.constant 0 : index
        %33 = vector.load %arg4[%c0_16, %c0_17] : memref<32x128xf32, #tpu.memory_space<vmem>>, vector<32x128xf32>
        tpu.vector_store %arg4[%c0_16, %c0_17], %32 {strides = array<i32>} : memref<32x128xf32, #tpu.memory_space<vmem>>, vector<32x128xf32>,
      } else {
      }
      %c0_i32_11 = arith.constant 0 : i32
      %26 = arith.cmpi eq, %4, %c0_i32_11 : i32
      %27 = arith.extui %26 : i1 to i32
      %c0_i32_12 = arith.constant 0 : i32
      %28 = arith.cmpi ne, %27, %c0_i32_12 : i32
      scf.if %28 {
        %c4096_i32 = arith.constant 4096 : i32
        %29 = arith.muli %4, %c4096_i32 : i32
        %30 = tpu.iota {dimensions = array<i32: 0>} : vector<32x128xi32>
        %31 = tpu.iota {dimensions = array<i32: 1>} : vector<32x128xi32>
        %c128_i32 = arith.constant 128 : i32
        %32 = vector.broadcast %c128_i32 : i32 to vector<32x128xi32>
        %33 = arith.muli %30, %32 : vector<32x128xi32>
        %34 = vector.broadcast %29 : i32 to vector<32x128xi32>
        %35 = arith.addi %34, %33 : vector<32x128xi32>
        %36 = arith.addi %35, %31 : vector<32x128xi32>
        %c2048_i32 = arith.constant 2048 : i32
        %37 = vector.broadcast %c2048_i32 : i32 to vector<32x128xi32>
        %38 = arith.cmpi slt, %36, %37 : vector<32x128xi32>
        %cst_13 = arith.constant 0.000000e+00 : f32
        %39 = vector.broadcast %cst_13 : f32 to vector<32x128xf32>
        %40 = arith.select %38, %22, %39 : vector<32x128xi1>, vector<32x128xf32>
        %c0_14 = arith.constant 0 : index
        %c0_15 = arith.constant 0 : index
        %41 = vector.load %arg4[%c0_14, %c0_15] : memref<32x128xf32, #tpu.memory_space<vmem>>, vector<32x128xf32>
        %42 = vector.shape_cast %40 : vector<32x128xf32> to vector<1x32x128xf32>
        %cst_16 = arith.constant dense<0.000000e+00> : vector<32x128xf32>
        %43 = vector.multi_reduction <add>, %42, %cst_16 [0] : vector<1x32x128xf32> to vector<32x128xf32>
        %44 = arith.addf %41, %43 : vector<32x128xf32>
        %c0_17 = arith.constant 0 : index
        %c0_18 = arith.constant 0 : index
        %45 = vector.load %arg4[%c0_17, %c0_18] : memref<32x128xf32, #tpu.memory_space<vmem>>, vector<32x128xf32>
        tpu.vector_store %arg4[%c0_17, %c0_18], %44 {strides = array<i32>} : memref<32x128xf32, #tpu.memory_space<vmem>>, vector<32x128xf32>,
      } else {
      }
    } else {
    }
    return
  }
  func.func @transform_0(%arg0: i32, %arg1: i32) -> (i32, i32) {
    %c1_i32 = arith.constant 1 : i32
    %0 = arith.muli %arg0, %c1_i32 : i32
    %1 = arith.addi %0, %arg1 : i32
    %c0_i32 = arith.constant 0 : i32
    %2 = arith.minsi %1, %c0_i32 : i32
    %c0_i32_0 = arith.constant 0 : i32
    %c0_i32_1 = arith.constant 0 : i32
    return %2, %c0_i32_0 : i32, i32
  }
  func.func @transform_1(%arg0: i32, %arg1: i32) -> (i32, i32) {
    %c1_i32 = arith.constant 1 : i32
    %0 = arith.muli %arg0, %c1_i32 : i32
    %1 = arith.addi %0, %arg1 : i32
    %c0_i32 = arith.constant 0 : i32
    %2 = arith.minsi %1, %c0_i32 : i32
    %c0_i32_0 = arith.constant 0 : i32
    %c0_i32_1 = arith.constant 0 : i32
    return %2, %c0_i32_0 : i32, i32
  }
  func.func @transform_2(%arg0: i32, %arg1: i32) -> (i32, i32) {
    %c0_i32 = arith.constant 0 : i32
    %c0_i32_0 = arith.constant 0 : i32
    return %arg0, %c0_i32 : i32, i32
  }
}

</mosaic_0001>

<bundles_post_ra>
// kernel: tpu_custom_call.1
= control target key start
LH: loop header
LB: loop body
LE: loop exit
PB: predicated region body
PF: predicated region fallthrough
CT: control target
= control target key end

     0   :  { %7 = vsyncpa [#allocation3], 0  ;;  %s342_s0 = inlined_call_operand.hbm [shape: f32[32,128], index: 0, kind: input, shape index: {}]   ;;  %s343_s1 = inlined_call_operand.hbm [shape: f32[32,128], index: 1, kind: input, shape index: {}]   ;;  %s344_s2 = inlined_call_operand.hbm [shape: f32[32,128], index: 2, kind: output, shape index: {}]  }
   0x1   :  { %8 = vsyncpa [#allocation6], 0 }
   0x2   :  { %9 = vsyncpa [#allocation4], 0  ;;  %s304_s9 = smov [#allocation2]  }
   0x3   :  { %s21_s10 = sshll.u32 %s304_s9, 4  ;;  %s22_s10 = int_to_ptr.vmem [resolvable:$true] %s21_s10 }
   0x4   :  { %s246_s11 = scalar_lea.vmem %s22_s10, 512  ;;  %p251_p1 = scmp.lt.s32.totalorder %s22_s10, %s22_s10 }
   0x5   :  { %p247_p0 = scmp.ne.s32.totalorder %s22_s10, %s246_s11  ;;  %p252_p2 = scmp.lt.s32.totalorder %s246_s11, %s246_s11 }
   0x7   :  { %p253_p3 = por %p252_p2, %p251_p1 }
   0x9   :  { %p254_p4 = pnand %p253_p3, %p247_p0 }
   0xb   :  { %257 = shalt.err (!%p254_p4)
}
   0xc   :  { %s305_s12 = smov 128   ;;  %s306_s13 = smov 8  }
   0xd   :  { %27 = dma.hbm_to_vmem [thread:$0]  %s342_s0, 512, %s22_s10, [#allocation3], %s305_s12, %s305_s12, %s306_s13  }
   0xe   :  { %s307_s16 = smov [#allocation5]  }
   0xf   :  { %s39_s17 = sshll.u32 %s307_s16, 4  ;;  %s40_s17 = int_to_ptr.vmem [resolvable:$true] %s39_s17 }
  0x10   :  { %s266_s18 = scalar_lea.vmem %s40_s17, 512  ;;  %p271_p6 = scmp.lt.s32.totalorder %s40_s17, %s40_s17 }
  0x11   :  { %p267_p5 = scmp.ne.s32.totalorder %s40_s17, %s266_s18  ;;  %p272_p7 = scmp.lt.s32.totalorder %s266_s18, %s266_s18 }
  0x13   :  { %p273_p8 = por %p272_p7, %p271_p6 }
  0x15   :  { %p274_p9 = pnand %p273_p8, %p267_p5 }
  0x17   :  { %277 = shalt.err (!%p274_p9)
}
  0x18   :  { %45 = dma.hbm_to_vmem [thread:$0]  %s343_s1, 512, %s40_s17, [#allocation6], %s305_s12, %s305_s12, %s306_s13  }
  0x19   :  { %298 = dma.done.wait [#allocation3], 512  }
  0x1a   :  { %299 = vsyncadd [#allocation3], 4294966784 }
  0x1b   :  { %300 = dma.done.wait [#allocation6], 512  }
  0x1c   :  { %301 = vsyncadd [#allocation6], 4294966784  ;;  %v73_v0 = vld [vmem:[#allocation2] sm:$0xff]  ;;  %v74_v1 = vld [vmem:[#allocation2 + $0x8] sm:$0xff]  ;;  %v150_v15 = vlaneseq  ;;  %s308_s0 = smov [#allocation7]  }
  0x1d   :  { %v77_v2 = vmax.f32 %v73_v0, 0.0  ;;  %v78_v3 = vmax.f32 %v74_v1, 0.0  ;;  %v75_v4 = vld [vmem:[#allocation2 + $0x10] sm:$0xff]  ;;  %v76_v6 = vld [vmem:[#allocation2 + $0x18] sm:$0xff]  ;;  %v85_v33 = vld [vmem:[#allocation5] sm:$0xff]  ;;  %s199_s1 = sshll.u32 %s308_s0, 4  ;;  %s200_s1 = int_to_ptr.vmem [resolvable:$true] %s199_s1 }
  0x1e   :  { %v79_v5 = vmax.f32 %v75_v4, 0.0  ;;  %v80_v9 = vmax.f32 %v76_v6, 0.0  ;;  %v151_v17 = vshrl.u32 %v150_v15, 7  ;;  %v156_v20 = vand.u32 127, %v150_v15  ;;  %v86_v40 = vld [vmem:[#allocation5 + $0x8] sm:$0xff]  ;;  %v87_v52 = vld [vmem:[#allocation5 + $0x10] sm:$0xff]  ;;  %p283_p11 = scmp.lt.s32.totalorder %s200_s1, %s200_s1 }
  0x1f   :  { %v81_v7 = vmin.f32 %v77_v2, 0.999  ;;  %v82_v8 = vmin.f32 %v78_v3, 0.999  ;;  %v88_v59 = vld [vmem:[#allocation5 + $0x18] sm:$0xff]  ;;  %s278_s21 = scalar_lea.vmem %s200_s1, 512 }
  0x20   :  { %v83_v10 = vmin.f32 %v79_v5, 0.999  ;;  %v84_v13 = vmin.f32 %v80_v9, 0.999  ;;  %v152_v18 = vadd.s32 8, %v151_v17  ;;  %v157_v21 = vmul.u32 128, %v151_v17  ;;  %p279_p10 = scmp.ne.s32.totalorder %s200_s1, %s278_s21  ;;  %p284_p12 = scmp.lt.s32.totalorder %s278_s21, %s278_s21 }
  0x21   :  { %222 = vlog2.f32 %v81_v7  ;;  %v101_v11 = vsub.f32 1.0, %v81_v7  ;;  %v102_v12 = vsub.f32 1.0, %v82_v8  ;;  %v153_v22 = vadd.s32 16, %v151_v17 }
  0x22   :  { %224 = vlog2.f32 %v82_v8  ;;  %v103_v14 = vsub.f32 1.0, %v83_v10  ;;  %v104_v16 = vsub.f32 1.0, %v84_v13  ;;  %v158_v25 = vmul.u32 128, %v152_v18  ;;  %p285_p13 = por %p284_p12, %p283_p11 }
  0x23   :  { %226 = vlog2.f32 %v101_v11  ;;  %v154_v28 = vadd.s32 24, %v151_v17  ;;  %v166_v34 = vadd.s32 %v157_v21, %v156_v20  ;;  %v159_v37 = vmul.u32 128, %v153_v22 }
  0x24   :  { %228 = vlog2.f32 %v102_v12  ;;  %v167_v41 = vadd.s32 %v158_v25, %v156_v20  ;;  %p286_p0 = pnand %p285_p13, %p279_p10 }
  0x25   :  { %230 = vlog2.f32 %v83_v10  ;;  %v160_v46 = vmul.u32 128, %v154_v28  ;;  %vm170_vm0 = vcmp.lt.s32.totalorder %v166_v34, 2048  ;;  %v168_v53 = vadd.s32 %v159_v37, %v156_v20 }
  0x26   :  { %232 = vlog2.f32 %v103_v14  ;;  %vm171_vm1 = vcmp.lt.s32.totalorder %v167_v41, 2048 }
  0x27   :  { %234 = vlog2.f32 %v84_v13  ;;  %v169_v60 = vadd.s32 %v160_v46, %v156_v20  ;;  %vm172_vm2 = vcmp.lt.s32.totalorder %v168_v53, 2048 }
  0x28   :  { %236 = vlog2.f32 %v104_v16 }
  0x29   :  { %vm173_vm3 = vcmp.lt.s32.totalorder %v169_v60, 2048 }
  0x2e   :  { %v223_v19 = vpop.eup %222 }
  0x2f   :  { %v225_v23 = vpop.eup %224  ;;  %v90_v24 = vmul.f32 0.6931472, %v223_v19 }
  0x30   :  { %v227_v26 = vpop.eup %226  ;;  %v92_v27 = vmul.f32 0.6931472, %v225_v23 }
  0x31   :  { %v229_v29 = vpop.eup %228  ;;  %v97_v30 = vmax.f32 %v90_v24, -100.0  ;;  %v106_v31 = vmul.f32 0.6931472, %v227_v26 }
  0x32   :  { %v231_v32 = vpop.eup %230  ;;  %v98_v35 = vmax.f32 %v92_v27, -100.0  ;;  %v108_v36 = vmul.f32 0.6931472, %v229_v29 }
  0x33   :  { %v233_v38 = vpop.eup %232  ;;  %v113_v39 = vsub.f32 %v97_v30, %v106_v31  ;;  %v94_v42 = vmul.f32 0.6931472, %v231_v32 }
  0x34   :  { %v235_v43 = vpop.eup %234  ;;  %v114_v44 = vsub.f32 %v98_v35, %v108_v36  ;;  %v110_v45 = vmul.f32 0.6931472, %v233_v38 }
  0x35   :  { %v237_v47 = vpop.eup %236  ;;  %v117_v48 = vmul.f32 %v113_v39, %v85_v33  ;;  %v99_v49 = vmax.f32 %v94_v42, -100.0  ;;  %v96_v50 = vmul.f32 0.6931472, %v235_v43 }
  0x36   :  { %v118_v51 = vmul.f32 %v114_v44, %v86_v40  ;;  %v112_v54 = vmul.f32 0.6931472, %v237_v47 }
  0x37   :  { %v121_v55 = vadd.f32 %v117_v48, %v106_v31  ;;  %v115_v56 = vsub.f32 %v99_v49, %v110_v45  ;;  %v100_v57 = vmax.f32 %v96_v50, -100.0 }
  0x38   :  { %v122_v58 = vadd.f32 %v118_v51, %v108_v36 }
  0x39   :  { %v174_v61 = vsel %vm170_vm0, %v121_v55, 0.0  ;;  %v119_v62 = vmul.f32 %v115_v56, %v87_v52  ;;  %v116_v63 = vsub.f32 %v100_v57, %v112_v54 }
  0x3a   :  { %v175_v0 = vsel %vm171_vm1, %v122_v58, 0.0  ;;  %190 = vst [vmem:[#allocation7] sm:$0xff] %v174_v61 }
  0x3b   :  { %v123_v1 = vadd.f32 %v119_v62, %v110_v45  ;;  %v120_v2 = vmul.f32 %v116_v63, %v88_v59  ;;  %191 = vst [vmem:[#allocation7 + $0x8] sm:$0xff] %v175_v0 }
  0x3d   :  { %v176_v3 = vsel %vm172_vm2, %v123_v1, 0.0  ;;  %v124_v4 = vadd.f32 %v120_v2, %v112_v54 }
  0x3e   :  { %192 = vst [vmem:[#allocation7 + $0x10] sm:$0xff] %v176_v3 }
  0x3f   :  { %v177_v5 = vsel %vm173_vm3, %v124_v4, 0.0 }
  0x40   :  { %193 = vst [vmem:[#allocation7 + $0x18] sm:$0xff] %v177_v5 }
  0x41   :  { %289 = shalt.err (!%p286_p0)
}
  0x42   :  { %205 = dma.vmem_to_hbm [thread:$0]  %s200_s1, 512, %s344_s2, [#allocation4], %s305_s12, %s305_s12, %s306_s13  }
  0x43   :  { %302 = dma.done.wait [#allocation4], 512  }
  0x44   :  { %303 = vsyncadd [#allocation4], 4294966784 }
  0x45   :  { %209 = vsyncpa [#allocation3], 1 }
  0x46   :  { %210 = vsyncpa [#allocation6], 1 }
  0x47   :  { %211 = vsyncpa [#allocation4], 1 }

</bundles_post_ra>
